<compile_context>
chip_gen: v7x
topology: tpu7x:2x2x1
jax: 0.10.0
libtpu: 0.0.40
codegen_flags: <defaults>
</compile_context>

<pallas_src>
import functools

import jax
import jax.numpy as jnp
from jax import lax
from jax.experimental import pallas as pl
from jax.experimental.pallas import tpu as pltpu

_BN_EPS = 1e-5


def _elu(x):
    # ELU(alpha=1); exp argument clamped so the "false" branch never overflows.
    return jnp.where(x > 0, x, jnp.exp(jnp.minimum(x, 0.0)) - 1.0)


def _ceil_to(n, m):
    return -(-n // m) * m


# ---------------------------------------------------------------------------
# Kernel: one grid step = Bt samples, batch folded into the matmul lane dim.
# ---------------------------------------------------------------------------
def eegnet_kernel(x1_ref, w1_ref, b1_ref, w34_ref, b34_ref,
                  p1_ref, s_ref, p2_ref, out_ref):
    f32 = jnp.float32
    cdt = w1_ref.dtype                      # MXU operand dtype (bf16 or f32)

    x1 = x1_ref[0]                          # (64*C_pad, Bt*T1p) wrapper-built im2col
    # Stage 1: conv1(1x64)+BN1 + depthwise conv2(Cx1)+BN2 fused into ONE matmul
    # over all Bt samples, single bias broadcast per grid step.
    h2 = jnp.dot(w1_ref[...], x1, preferred_element_type=f32) + b1_ref[...]
    h2 = _elu(h2).astype(cdt)               # (16, Bt*T1p)

    # AvgPool2d((1, 4)) per sample: block-diagonal constant matmul (padded lane
    # columns carry zero weight, so they never leak into the averages).
    h2p = jnp.dot(h2, p1_ref[...], preferred_element_type=f32).astype(cdt)  # (16, Bt*P1)
    # Dropout(p=0.25): identity in eval mode.

    # Stage 2: depthwise conv3(1x6) + pointwise conv4(1x1) + BN3 fused.  The
    # 6-tap im2col is realized with constant per-sample shift-selection
    # matrices (no in-kernel concatenate); accumulation over taps stays f32.
    n_t3 = s_ref.shape[2]                   # Bt*T3 (static)
    acc = jnp.zeros((16, n_t3), f32)
    for k in range(6):                      # static unroll over the 6 taps
        x2k = jnp.dot(h2p, s_ref[k], preferred_element_type=f32).astype(cdt)
        acc = acc + jnp.dot(w34_ref[k], x2k, preferred_element_type=f32)
    h4 = _elu(acc + b34_ref[...]).astype(cdt)                               # (16, Bt*T3)

    # AvgPool2d((1, 8)) per sample, then one dense store for the whole block.
    out_ref[0] = jnp.dot(h4, p2_ref[...], preferred_element_type=f32)       # (16, Bt*P2)
    # Dropout(p=0.25): identity in eval mode.


# ---------------------------------------------------------------------------
# Wrapper-side constants / block-size selection.
# ---------------------------------------------------------------------------
def _pool_matrix(win, n_in, n_out, dtype):
    rows = jnp.arange(n_in)[:, None]
    cols = jnp.arange(n_out)[None, :]
    return jnp.where(rows // win == cols, 1.0 / win, 0.0).astype(dtype)


def _shift_select(n_in, n_out, k, dtype):
    rows = jnp.arange(n_in)[:, None]
    cols = jnp.arange(n_out)[None, :]
    return jnp.where(rows == cols + k, 1.0, 0.0).astype(dtype)


def _block_diag(mat, n):
    return jnp.kron(jnp.eye(n, dtype=mat.dtype), mat)


def _vmem_estimate(bt, c_pad, t1p, p1, t3, p2, bpe):
    x_block = 2 * 64 * c_pad * bt * t1p * bpe              # double-buffered input block
    consts = (16 * 64 * c_pad * bpe                        # W1eff
              + (bt * t1p) * (bt * p1) * bpe               # pool1 (block-diag)
              + 6 * (bt * p1) * (bt * t3) * bpe            # tap-shift selections
              + (bt * t3) * (bt * p2) * bpe                # pool2 (block-diag)
              + 6 * 16 * 16 * bpe + 2 * 16 * 4)            # W34 taps + biases
    inter = 4 * 16 * (bt * t1p + 2 * bt * p1 + 3 * bt * t3)  # f32 temporaries
    out_block = 2 * 16 * bt * p2 * 4
    return x_block + consts + inter + out_block


def _pick_block_b(B, c_pad, t1p, p1, t3, p2, bpe, max_bt=32,
                  budget=20 * 1024 * 1024):
    # Largest divisor of B under the VMEM budget, keeping >= 2 grid steps when
    # possible so v7x's two TensorCores both get work.
    limit = min(max_bt, B if B < 2 else max(1, B // 2))
    best = 1
    for bt in range(1, limit + 1):
        if B % bt == 0 and _vmem_estimate(bt, c_pad, t1p, p1, t3, p2, bpe) <= budget:
            best = bt
    return best


# ---------------------------------------------------------------------------
# Forward pass.
# ---------------------------------------------------------------------------
def eegnet_v2_forward(x_bct, kparams, *, input_ch, input_time,
                      block_b=None, use_bf16=True):
    """x_bct: (B, C, T) float32 (NCHW input with the singleton channel squeezed).

    Returns (B, num_hidden), num_hidden = 16 * floor((floor((T-63)/4)-5)/8),
    matching output.view(B, -1) of the eval-mode PyTorch module.
    """
    B, C, T = x_bct.shape
    assert C == input_ch and T == input_time
    T1 = T - 63            # Conv2d(1, 8, (1, 64))
    P1 = T1 // 4           # AvgPool2d((1, 4))
    T3 = P1 - 5            # depthwise Conv2d(16, 16, (1, 6))
    P2 = T3 // 8           # AvgPool2d((1, 8))
    assert T1 > 0 and T3 > 0 and P2 > 0, "input_time too small for EEGNet_v2"
    num_hidden = 16 * P2

    cdt = jnp.bfloat16 if use_bf16 else jnp.float32
    bpe = 2 if use_bf16 else 4

    c_pad = _ceil_to(C, 8)
    T1p = _ceil_to(T1, 8)  # per-sample lane padding (Bt*T1p multiple of 128 when Bt%16==0)

    Bt = _pick_block_b(B, c_pad, T1p, P1, T3, P2, bpe) if block_b is None else block_b
    assert B % Bt == 0, "block_b must divide the batch size"
    G = B // Bt

    w1eff, b1eff, w34eff, b34eff = kparams       # (16,64*c_pad), (16,1), (16,96), (16,1)
    assert w1eff.shape == (16, 64 * c_pad)

    # ---- wrapper-side stage-1 im2col:
    # X1[g, k*c_pad + c, bb*T1p + t] = x[g*Bt + bb, c, t + k]
    if c_pad != C:
        x_bct = jnp.pad(x_bct, ((0, 0), (0, c_pad - C), (0, 0)))
    cols = jnp.stack([x_bct[:, :, k:k + T1] for k in range(64)], axis=1)  # (B,64,c_pad,T1)
    cols = jnp.pad(cols, ((0, 0), (0, 0), (0, 0), (0, T1p - T1)))
    x1 = (cols.reshape(G, Bt, 64 * c_pad, T1p)
              .transpose(0, 2, 1, 3)
              .reshape(G, 64 * c_pad, Bt * T1p)
              .astype(cdt))

    # ---- constants (same block index every step -> VMEM resident across grid)
    pool1 = _block_diag(_pool_matrix(4, T1p, P1, cdt), Bt)                 # (Bt*T1p, Bt*P1)
    shifts = jnp.stack([_block_diag(_shift_select(P1, T3, k, cdt), Bt)
                        for k in range(6)], axis=0)                        # (6, Bt*P1, Bt*T3)
    pool2 = _block_diag(_pool_matrix(8, T3, P2, cdt), Bt)                  # (Bt*T3, Bt*P2)

    w1 = w1eff.astype(cdt)
    w34 = w34eff.reshape(16, 6, 16).transpose(1, 0, 2).astype(cdt)         # (6, 16, 16)
    b1 = b1eff.astype(jnp.float32)
    b34 = b34eff.astype(jnp.float32)

    out3 = pl.pallas_call(
        eegnet_kernel,
        out_shape=jax.ShapeDtypeStruct((G, 16, Bt * P2), jnp.float32),
        grid=(G,),
        in_specs=[
            pl.BlockSpec((1, 64 * c_pad, Bt * T1p), lambda i: (i, 0, 0)),
            pl.BlockSpec((16, 64 * c_pad), lambda i: (0, 0)),
            pl.BlockSpec((16, 1), lambda i: (0, 0)),
            pl.BlockSpec((6, 16, 16), lambda i: (0, 0, 0)),
            pl.BlockSpec((16, 1), lambda i: (0, 0)),
            pl.BlockSpec((Bt * T1p, Bt * P1), lambda i: (0, 0)),
            pl.BlockSpec((6, Bt * P1, Bt * T3), lambda i: (0, 0, 0)),
            pl.BlockSpec((Bt * T3, Bt * P2), lambda i: (0, 0)),
        ],
        out_specs=pl.BlockSpec((1, 16, Bt * P2), lambda i: (i, 0, 0)),
        compiler_params=pltpu.CompilerParams(
            dimension_semantics=("parallel",)),
    )(x1, w1, b1, w34, b34, pool1, shifts, pool2)

    # Restore PyTorch's .view(B, -1) ordering: out[b, o*P2 + p2].
    out = (out3.reshape(G, 16, Bt, P2)
               .transpose(0, 2, 1, 3)
               .reshape(B, num_hidden))
    return out


# ---------------------------------------------------------------------------
# Deterministic parameter construction, host-side folding, pure-JAX reference.
# ---------------------------------------------------------------------------
def make_raw_params(key, input_ch):
    ks = jax.random.split(key, 20)
    r = lambda k, s, sc=0.1: sc * jax.random.normal(k, s, jnp.float32)

    def bn(k0, k1, k2, k3, n):
        gamma = 1.0 + r(k0, (n,))
        beta = r(k1, (n,))
        mean = r(k2, (n,))
        var = 1.0 + 0.1 * jnp.abs(jax.random.normal(k3, (n,), jnp.float32))
        return gamma, beta, mean, var

    raw = {
        "w1": r(ks[0], (8, 1, 1, 64)), "b1": r(ks[1], (8,)),
        "bn1": bn(ks[2], ks[3], ks[4], ks[5], 8),
        "w2": r(ks[6], (16, 1, input_ch, 1)), "b2": r(ks[7], (16,)),
        "bn2": bn(ks[8], ks[9], ks[10], ks[11], 16),
        "w3": r(ks[12], (16, 1, 1, 6)), "b3": r(ks[13], (16,)),
        "w4": r(ks[14], (16, 16, 1, 1)), "b4": r(ks[15], (16,)),
        "bn3": bn(ks[16], ks[17], ks[18], ks[19], 16),
    }
    return raw


def fold_params_for_kernel(raw, input_ch):
    """Fold conv+BN (eval mode) into two effective matmul weights + biases."""
    def fold(bn):
        g, b, m, v = bn
        s = g / jnp.sqrt(v + _BN_EPS)
        t = b - m * s
        return s, t

    s1, t1 = fold(raw["bn1"])
    s2, t2 = fold(raw["bn2"])
    s3, t3 = fold(raw["bn3"])

    w1 = raw["w1"].reshape(8, 64)
    b1 = raw["b1"]
    w2 = raw["w2"].reshape(16, input_ch)
    b2 = raw["b2"]
    w3 = raw["w3"].reshape(16, 6)
    b3 = raw["b3"]
    w4 = raw["w4"].reshape(16, 16)
    b4 = raw["b4"]

    # Conv2d(8,16,(C,1),groups=8): output channel o consumes input channel o//2.
    s1d = jnp.repeat(s1, 2)
    t1d = jnp.repeat(t1, 2)
    b1d = jnp.repeat(b1, 2)
    w1d = jnp.repeat(w1, 2, axis=0)                                 # (16, 64)

    # W1eff[o, k, c] = s2[o] * w2[o, c] * s1[o//2] * w1[o//2, k]
    w1eff = (s2[:, None, None]
             * (s1d[:, None] * w1d)[:, :, None]
             * w2[:, None, :])                                      # (16, 64, C)
    c_pad = _ceil_to(input_ch, 8)
    if c_pad != input_ch:
        w1eff = jnp.pad(w1eff, ((0, 0), (0, 0), (0, c_pad - input_ch)))
    w1eff = w1eff.reshape(16, 64 * c_pad)
    b1eff = s2 * (w2.sum(axis=1) * (s1d * b1d + t1d) + b2) + t2

    # W34eff[o, k, c] = s3[o] * w4[o, c] * w3[c, k]
    w34eff = s3[:, None, None] * w3.T[None, :, :] * w4[:, None, :]  # (16, 6, 16)
    w34eff = w34eff.reshape(16, 96)
    b34eff = s3 * (w4 @ b3 + b4) + t3

    col = lambda v: v.reshape(16, 1).astype(jnp.float32)
    return (w1eff.astype(jnp.float32), col(b1eff),
            w34eff.astype(jnp.float32), col(b34eff))


def reference_forward(x_nchw, raw):
    """Pure-JAX reference mirroring torch's eval-mode convnet (NCHW)."""
    dn = ("NCHW", "OIHW", "NCHW")

    def bn(y, p):
        g, b, m, v = p
        sh = (1, -1, 1, 1)
        return ((y - m.reshape(sh)) / jnp.sqrt(v.reshape(sh) + _BN_EPS)
                * g.reshape(sh) + b.reshape(sh))

    elu = lambda y: jnp.where(y > 0, y, jnp.exp(jnp.minimum(y, 0.0)) - 1.0)

    y = lax.conv_general_dilated(x_nchw, raw["w1"], (1, 1), "VALID",
                                 dimension_numbers=dn)
    y = y + raw["b1"].reshape(1, -1, 1, 1)
    y = bn(y, raw["bn1"])
    y = lax.conv_general_dilated(y, raw["w2"], (1, 1), "VALID",
                                 dimension_numbers=dn, feature_group_count=8)
    y = y + raw["b2"].reshape(1, -1, 1, 1)
    y = elu(bn(y, raw["bn2"]))
    y = lax.reduce_window(y, 0.0, lax.add, (1, 1, 1, 4), (1, 1, 1, 4),
                          "VALID") / 4.0
    y = lax.conv_general_dilated(y, raw["w3"], (1, 1), "VALID",
                                 dimension_numbers=dn, feature_group_count=16)
    y = y + raw["b3"].reshape(1, -1, 1, 1)
    y = lax.conv_general_dilated(y, raw["w4"], (1, 1), "VALID",
                                 dimension_numbers=dn)
    y = y + raw["b4"].reshape(1, -1, 1, 1)
    y = elu(bn(y, raw["bn3"]))
    y = lax.reduce_window(y, 0.0, lax.add, (1, 1, 1, 8), (1, 1, 1, 8),
                          "VALID") / 8.0
    return y.reshape(y.shape[0], -1)


if __name__ == "__main__":
    B, INPUT_CH, INPUT_TIME = 4, 4, 128   # small but valid (T >= 115 required)

    key = jax.random.PRNGKey(0)
    kx, kp = jax.random.split(key)
    x_nchw = jax.random.normal(kx, (B, 1, INPUT_CH, INPUT_TIME), jnp.float32)
    raw = make_raw_params(kp, INPUT_CH)
    kparams = fold_params_for_kernel(raw, INPUT_CH)
    x_bct = x_nchw[:, 0, :, :]            # squeeze the singleton conv-input channel

    ref = jax.block_until_ready(reference_forward(x_nchw, raw))

    # f32 MXU operands: tight-tolerance correctness check.
    fwd_f32 = jax.jit(functools.partial(
        eegnet_v2_forward, input_ch=INPUT_CH, input_time=INPUT_TIME,
        use_bf16=False))
    out_f32 = jax.block_until_ready(fwd_f32(x_bct, kparams))
    if not jnp.allclose(out_f32, ref, atol=1e-3, rtol=1e-3):
        raise AssertionError(
            f"f32 mismatch: max abs err = {float(jnp.max(jnp.abs(out_f32 - ref)))}")

    # bf16 MXU operands with f32 accumulation (perf path): looser tolerance.
    fwd_bf16 = jax.jit(functools.partial(
        eegnet_v2_forward, input_ch=INPUT_CH, input_time=INPUT_TIME,
        use_bf16=True))
    out_bf16 = jax.block_until_ready(fwd_bf16(x_bct, kparams))
    if not jnp.allclose(out_bf16, ref, atol=3e-2, rtol=3e-2):
        raise AssertionError(
            f"bf16 mismatch: max abs err = {float(jnp.max(jnp.abs(out_bf16 - ref)))}")

    print("KERNEL_OK")
</pallas_src>

<mosaic_0001>
module attributes {stable_mosaic.version = 11 : i64} {
  func.func @eegnet_kernel(%arg0: i32, %arg1: memref<1x512x144xf32, #tpu.memory_space<vmem>>, %arg2: memref<16x512xf32, #tpu.memory_space<vmem>>, %arg3: memref<16x1xf32, #tpu.memory_space<vmem>>, %arg4: memref<6x16x16xf32, #tpu.memory_space<vmem>>, %arg5: memref<16x1xf32, #tpu.memory_space<vmem>>, %arg6: memref<144x32xf32, #tpu.memory_space<vmem>>, %arg7: memref<6x32x22xf32, #tpu.memory_space<vmem>>, %arg8: memref<22x2xf32, #tpu.memory_space<vmem>>, %arg9: memref<1x16x2xf32, #tpu.memory_space<vmem>>) attributes {dimension_semantics = [#tpu.dimension_semantics<parallel>], iteration_bounds = array<i64: 2>, scalar_prefetch = 0 : i64, scratch_operands = 0 : i64, tpu.core_type = #tpu.core_type<tc>, window_params = [{transform_indices = @transform_0, window_bounds = array<i64: 1, 512, 144>}, {pipeline_mode = #tpu.pipeline_mode<synchronous>, transform_indices = @transform_1, window_bounds = array<i64: 16, 512>}, {pipeline_mode = #tpu.pipeline_mode<synchronous>, transform_indices = @transform_2, window_bounds = array<i64: 16, 1>}, {pipeline_mode = #tpu.pipeline_mode<synchronous>, transform_indices = @transform_3, window_bounds = array<i64: 6, 16, 16>}, {pipeline_mode = #tpu.pipeline_mode<synchronous>, transform_indices = @transform_4, window_bounds = array<i64: 16, 1>}, {pipeline_mode = #tpu.pipeline_mode<synchronous>, transform_indices = @transform_5, window_bounds = array<i64: 144, 32>}, {pipeline_mode = #tpu.pipeline_mode<synchronous>, transform_indices = @transform_6, window_bounds = array<i64: 6, 32, 22>}, {pipeline_mode = #tpu.pipeline_mode<synchronous>, transform_indices = @transform_7, window_bounds = array<i64: 22, 2>}, {transform_indices = @transform_8, window_bounds = array<i64: 1, 16, 2>}]} {
    %c0 = arith.constant 0 : index
    %c0_0 = arith.constant 0 : index
    %c0_1 = arith.constant 0 : index
    %0 = vector.load %arg1[%c0, %c0_0, %c0_1] : memref<1x512x144xf32, #tpu.memory_space<vmem>>, vector<1x512x144xf32>
    %1 = vector.shape_cast %0 : vector<1x512x144xf32> to vector<512x144xf32>
    %c0_2 = arith.constant 0 : index
    %c0_3 = arith.constant 0 : index
    %2 = vector.load %arg2[%c0_2, %c0_3] : memref<16x512xf32, #tpu.memory_space<vmem>>, vector<16x512xf32>
    %cst = arith.constant dense<0.000000e+00> : vector<16x144xf32>
    %3 = tpu.matmul %2, %1, %cst {dimension_numbers = #tpu.dot_dimension_numbers<[1], [0], [0], [1], [0, 0, 1, 1], [], []>} : vector<16x512xf32>, vector<512x144xf32>, vector<16x144xf32> -> vector<16x144xf32>
    %c0_4 = arith.constant 0 : index
    %c0_5 = arith.constant 0 : index
    %4 = vector.load %arg3[%c0_4, %c0_5] : memref<16x1xf32, #tpu.memory_space<vmem>>, vector<16x1xf32>
    %5 = vector.broadcast %4 : vector<16x1xf32> to vector<16x144xf32>
    %6 = arith.addf %3, %5 : vector<16x144xf32>
    %cst_6 = arith.constant 0.000000e+00 : f32
    %7 = vector.broadcast %cst_6 : f32 to vector<16x144xf32>
    %8 = arith.cmpf ogt, %6, %7 : vector<16x144xf32>
    %cst_7 = arith.constant 0.000000e+00 : f32
    %9 = vector.broadcast %cst_7 : f32 to vector<16x144xf32>
    %10 = arith.minimumf %6, %9 : vector<16x144xf32>
    %11 = math.exp %10 : vector<16x144xf32>
    %cst_8 = arith.constant 1.000000e+00 : f32
    %12 = vector.broadcast %cst_8 : f32 to vector<16x144xf32>
    %13 = arith.subf %11, %12 : vector<16x144xf32>
    %14 = arith.select %8, %6, %13 : vector<16x144xi1>, vector<16x144xf32>
    %c0_9 = arith.constant 0 : index
    %c0_10 = arith.constant 0 : index
    %15 = vector.load %arg6[%c0_9, %c0_10] : memref<144x32xf32, #tpu.memory_space<vmem>>, vector<144x32xf32>
    %cst_11 = arith.constant dense<0.000000e+00> : vector<16x32xf32>
    %16 = tpu.matmul %14, %15, %cst_11 {dimension_numbers = #tpu.dot_dimension_numbers<[1], [0], [0], [1], [0, 0, 1, 1], [], []>} : vector<16x144xf32>, vector<144x32xf32>, vector<16x32xf32> -> vector<16x32xf32>
    %cst_12 = arith.constant 0.000000e+00 : f32
    %17 = vector.broadcast %cst_12 : f32 to vector<16x22xf32>
    %c0_13 = arith.constant 0 : index
    %c0_14 = arith.constant 0 : index
    %c0_15 = arith.constant 0 : index
    %18 = vector.load %arg7[%c0_13, %c0_14, %c0_15] : memref<6x32x22xf32, #tpu.memory_space<vmem>>, vector<1x32x22xf32>
    %19 = vector.shape_cast %18 : vector<1x32x22xf32> to vector<32x22xf32>
    %cst_16 = arith.constant dense<0.000000e+00> : vector<16x22xf32>
    %20 = tpu.matmul %16, %19, %cst_16 {dimension_numbers = #tpu.dot_dimension_numbers<[1], [0], [0], [1], [0, 0, 1, 1], [], []>} : vector<16x32xf32>, vector<32x22xf32>, vector<16x22xf32> -> vector<16x22xf32>
    %c0_17 = arith.constant 0 : index
    %c0_18 = arith.constant 0 : index
    %c0_19 = arith.constant 0 : index
    %21 = vector.load %arg4[%c0_17, %c0_18, %c0_19] : memref<6x16x16xf32, #tpu.memory_space<vmem>>, vector<1x16x16xf32>
    %22 = vector.shape_cast %21 : vector<1x16x16xf32> to vector<16x16xf32>
    %cst_20 = arith.constant dense<0.000000e+00> : vector<16x22xf32>
    %23 = tpu.matmul %22, %20, %cst_20 {dimension_numbers = #tpu.dot_dimension_numbers<[1], [0], [0], [1], [0, 0, 1, 1], [], []>} : vector<16x16xf32>, vector<16x22xf32>, vector<16x22xf32> -> vector<16x22xf32>
    %24 = arith.addf %17, %23 : vector<16x22xf32>
    %c1 = arith.constant 1 : index
    %c0_21 = arith.constant 0 : index
    %c0_22 = arith.constant 0 : index
    %25 = vector.load %arg7[%c1, %c0_21, %c0_22] : memref<6x32x22xf32, #tpu.memory_space<vmem>>, vector<1x32x22xf32>
    %26 = vector.shape_cast %25 : vector<1x32x22xf32> to vector<32x22xf32>
    %cst_23 = arith.constant dense<0.000000e+00> : vector<16x22xf32>
    %27 = tpu.matmul %16, %26, %cst_23 {dimension_numbers = #tpu.dot_dimension_numbers<[1], [0], [0], [1], [0, 0, 1, 1], [], []>} : vector<16x32xf32>, vector<32x22xf32>, vector<16x22xf32> -> vector<16x22xf32>
    %c1_24 = arith.constant 1 : index
    %c0_25 = arith.constant 0 : index
    %c0_26 = arith.constant 0 : index
    %28 = vector.load %arg4[%c1_24, %c0_25, %c0_26] : memref<6x16x16xf32, #tpu.memory_space<vmem>>, vector<1x16x16xf32>
    %29 = vector.shape_cast %28 : vector<1x16x16xf32> to vector<16x16xf32>
    %cst_27 = arith.constant dense<0.000000e+00> : vector<16x22xf32>
    %30 = tpu.matmul %29, %27, %cst_27 {dimension_numbers = #tpu.dot_dimension_numbers<[1], [0], [0], [1], [0, 0, 1, 1], [], []>} : vector<16x16xf32>, vector<16x22xf32>, vector<16x22xf32> -> vector<16x22xf32>
    %31 = arith.addf %24, %30 : vector<16x22xf32>
    %c2 = arith.constant 2 : index
    %c0_28 = arith.constant 0 : index
    %c0_29 = arith.constant 0 : index
    %32 = vector.load %arg7[%c2, %c0_28, %c0_29] : memref<6x32x22xf32, #tpu.memory_space<vmem>>, vector<1x32x22xf32>
    %33 = vector.shape_cast %32 : vector<1x32x22xf32> to vector<32x22xf32>
    %cst_30 = arith.constant dense<0.000000e+00> : vector<16x22xf32>
    %34 = tpu.matmul %16, %33, %cst_30 {dimension_numbers = #tpu.dot_dimension_numbers<[1], [0], [0], [1], [0, 0, 1, 1], [], []>} : vector<16x32xf32>, vector<32x22xf32>, vector<16x22xf32> -> vector<16x22xf32>
    %c2_31 = arith.constant 2 : index
    %c0_32 = arith.constant 0 : index
    %c0_33 = arith.constant 0 : index
    %35 = vector.load %arg4[%c2_31, %c0_32, %c0_33] : memref<6x16x16xf32, #tpu.memory_space<vmem>>, vector<1x16x16xf32>
    %36 = vector.shape_cast %35 : vector<1x16x16xf32> to vector<16x16xf32>
    %cst_34 = arith.constant dense<0.000000e+00> : vector<16x22xf32>
    %37 = tpu.matmul %36, %34, %cst_34 {dimension_numbers = #tpu.dot_dimension_numbers<[1], [0], [0], [1], [0, 0, 1, 1], [], []>} : vector<16x16xf32>, vector<16x22xf32>, vector<16x22xf32> -> vector<16x22xf32>
    %38 = arith.addf %31, %37 : vector<16x22xf32>
    %c3 = arith.constant 3 : index
    %c0_35 = arith.constant 0 : index
    %c0_36 = arith.constant 0 : index
    %39 = vector.load %arg7[%c3, %c0_35, %c0_36] : memref<6x32x22xf32, #tpu.memory_space<vmem>>, vector<1x32x22xf32>
    %40 = vector.shape_cast %39 : vector<1x32x22xf32> to vector<32x22xf32>
    %cst_37 = arith.constant dense<0.000000e+00> : vector<16x22xf32>
    %41 = tpu.matmul %16, %40, %cst_37 {dimension_numbers = #tpu.dot_dimension_numbers<[1], [0], [0], [1], [0, 0, 1, 1], [], []>} : vector<16x32xf32>, vector<32x22xf32>, vector<16x22xf32> -> vector<16x22xf32>
    %c3_38 = arith.constant 3 : index
    %c0_39 = arith.constant 0 : index
    %c0_40 = arith.constant 0 : index
    %42 = vector.load %arg4[%c3_38, %c0_39, %c0_40] : memref<6x16x16xf32, #tpu.memory_space<vmem>>, vector<1x16x16xf32>
    %43 = vector.shape_cast %42 : vector<1x16x16xf32> to vector<16x16xf32>
    %cst_41 = arith.constant dense<0.000000e+00> : vector<16x22xf32>
    %44 = tpu.matmul %43, %41, %cst_41 {dimension_numbers = #tpu.dot_dimension_numbers<[1], [0], [0], [1], [0, 0, 1, 1], [], []>} : vector<16x16xf32>, vector<16x22xf32>, vector<16x22xf32> -> vector<16x22xf32>
    %45 = arith.addf %38, %44 : vector<16x22xf32>
    %c4 = arith.constant 4 : index
    %c0_42 = arith.constant 0 : index
    %c0_43 = arith.constant 0 : index
    %46 = vector.load %arg7[%c4, %c0_42, %c0_43] : memref<6x32x22xf32, #tpu.memory_space<vmem>>, vector<1x32x22xf32>
    %47 = vector.shape_cast %46 : vector<1x32x22xf32> to vector<32x22xf32>
    %cst_44 = arith.constant dense<0.000000e+00> : vector<16x22xf32>
    %48 = tpu.matmul %16, %47, %cst_44 {dimension_numbers = #tpu.dot_dimension_numbers<[1], [0], [0], [1], [0, 0, 1, 1], [], []>} : vector<16x32xf32>, vector<32x22xf32>, vector<16x22xf32> -> vector<16x22xf32>
    %c4_45 = arith.constant 4 : index
    %c0_46 = arith.constant 0 : index
    %c0_47 = arith.constant 0 : index
    %49 = vector.load %arg4[%c4_45, %c0_46, %c0_47] : memref<6x16x16xf32, #tpu.memory_space<vmem>>, vector<1x16x16xf32>
    %50 = vector.shape_cast %49 : vector<1x16x16xf32> to vector<16x16xf32>
    %cst_48 = arith.constant dense<0.000000e+00> : vector<16x22xf32>
    %51 = tpu.matmul %50, %48, %cst_48 {dimension_numbers = #tpu.dot_dimension_numbers<[1], [0], [0], [1], [0, 0, 1, 1], [], []>} : vector<16x16xf32>, vector<16x22xf32>, vector<16x22xf32> -> vector<16x22xf32>
    %52 = arith.addf %45, %51 : vector<16x22xf32>
    %c5 = arith.constant 5 : index
    %c0_49 = arith.constant 0 : index
    %c0_50 = arith.constant 0 : index
    %53 = vector.load %arg7[%c5, %c0_49, %c0_50] : memref<6x32x22xf32, #tpu.memory_space<vmem>>, vector<1x32x22xf32>
    %54 = vector.shape_cast %53 : vector<1x32x22xf32> to vector<32x22xf32>
    %cst_51 = arith.constant dense<0.000000e+00> : vector<16x22xf32>
    %55 = tpu.matmul %16, %54, %cst_51 {dimension_numbers = #tpu.dot_dimension_numbers<[1], [0], [0], [1], [0, 0, 1, 1], [], []>} : vector<16x32xf32>, vector<32x22xf32>, vector<16x22xf32> -> vector<16x22xf32>
    %c5_52 = arith.constant 5 : index
    %c0_53 = arith.constant 0 : index
    %c0_54 = arith.constant 0 : index
    %56 = vector.load %arg4[%c5_52, %c0_53, %c0_54] : memref<6x16x16xf32, #tpu.memory_space<vmem>>, vector<1x16x16xf32>
    %57 = vector.shape_cast %56 : vector<1x16x16xf32> to vector<16x16xf32>
    %cst_55 = arith.constant dense<0.000000e+00> : vector<16x22xf32>
    %58 = tpu.matmul %57, %55, %cst_55 {dimension_numbers = #tpu.dot_dimension_numbers<[1], [0], [0], [1], [0, 0, 1, 1], [], []>} : vector<16x16xf32>, vector<16x22xf32>, vector<16x22xf32> -> vector<16x22xf32>
    %59 = arith.addf %52, %58 : vector<16x22xf32>
    %c0_56 = arith.constant 0 : index
    %c0_57 = arith.constant 0 : index
    %60 = vector.load %arg5[%c0_56, %c0_57] : memref<16x1xf32, #tpu.memory_space<vmem>>, vector<16x1xf32>
    %61 = vector.broadcast %60 : vector<16x1xf32> to vector<16x22xf32>
    %62 = arith.addf %59, %61 : vector<16x22xf32>
    %cst_58 = arith.constant 0.000000e+00 : f32
    %63 = vector.broadcast %cst_58 : f32 to vector<16x22xf32>
    %64 = arith.cmpf ogt, %62, %63 : vector<16x22xf32>
    %cst_59 = arith.constant 0.000000e+00 : f32
    %65 = vector.broadcast %cst_59 : f32 to vector<16x22xf32>
    %66 = arith.minimumf %62, %65 : vector<16x22xf32>
    %67 = math.exp %66 : vector<16x22xf32>
    %cst_60 = arith.constant 1.000000e+00 : f32
    %68 = vector.broadcast %cst_60 : f32 to vector<16x22xf32>
    %69 = arith.subf %67, %68 : vector<16x22xf32>
    %70 = arith.select %64, %62, %69 : vector<16x22xi1>, vector<16x22xf32>
    %c0_61 = arith.constant 0 : index
    %c0_62 = arith.constant 0 : index
    %71 = vector.load %arg8[%c0_61, %c0_62] : memref<22x2xf32, #tpu.memory_space<vmem>>, vector<22x2xf32>
    %cst_63 = arith.constant dense<0.000000e+00> : vector<16x2xf32>
    %72 = tpu.matmul %70, %71, %cst_63 {dimension_numbers = #tpu.dot_dimension_numbers<[1], [0], [0], [1], [0, 0, 1, 1], [], []>} : vector<16x22xf32>, vector<22x2xf32>, vector<16x2xf32> -> vector<16x2xf32>
    %c0_64 = arith.constant 0 : index
    %c0_65 = arith.constant 0 : index
    %c0_66 = arith.constant 0 : index
    %73 = vector.load %arg9[%c0_64, %c0_65, %c0_66] : memref<1x16x2xf32, #tpu.memory_space<vmem>>, vector<1x16x2xf32>
    %74 = vector.shape_cast %73 : vector<1x16x2xf32> to vector<16x2xf32>
    %75 = vector.shape_cast %72 : vector<16x2xf32> to vector<1x16x2xf32>
    tpu.vector_store %arg9[%c0_64, %c0_65, %c0_66], %75 {strides = array<i32>} : memref<1x16x2xf32, #tpu.memory_space<vmem>>, vector<1x16x2xf32>,
    return
  }
  func.func @transform_0(%arg0: i32) -> (i32, i32, i32) {
    %c0_i32 = arith.constant 0 : i32
    %c0_i32_0 = arith.constant 0 : i32
    %c0_i32_1 = arith.constant 0 : i32
    return %arg0, %c0_i32, %c0_i32_0 : i32, i32, i32
  }
  func.func @transform_1(%arg0: i32) -> (i32, i32) {
    %c0_i32 = arith.constant 0 : i32
    %c0_i32_0 = arith.constant 0 : i32
    %c0_i32_1 = arith.constant 0 : i32
    return %c0_i32, %c0_i32_0 : i32, i32
  }
  func.func @transform_2(%arg0: i32) -> (i32, i32) {
    %c0_i32 = arith.constant 0 : i32
    %c0_i32_0 = arith.constant 0 : i32
    %c0_i32_1 = arith.constant 0 : i32
    return %c0_i32, %c0_i32_0 : i32, i32
  }
  func.func @transform_3(%arg0: i32) -> (i32, i32, i32) {
    %c0_i32 = arith.constant 0 : i32
    %c0_i32_0 = arith.constant 0 : i32
    %c0_i32_1 = arith.constant 0 : i32
    %c0_i32_2 = arith.constant 0 : i32
    return %c0_i32, %c0_i32_0, %c0_i32_1 : i32, i32, i32
  }
  func.func @transform_4(%arg0: i32) -> (i32, i32) {
    %c0_i32 = arith.constant 0 : i32
    %c0_i32_0 = arith.constant 0 : i32
    %c0_i32_1 = arith.constant 0 : i32
    return %c0_i32, %c0_i32_0 : i32, i32
  }
  func.func @transform_5(%arg0: i32) -> (i32, i32) {
    %c0_i32 = arith.constant 0 : i32
    %c0_i32_0 = arith.constant 0 : i32
    %c0_i32_1 = arith.constant 0 : i32
    return %c0_i32, %c0_i32_0 : i32, i32
  }
  func.func @transform_6(%arg0: i32) -> (i32, i32, i32) {
    %c0_i32 = arith.constant 0 : i32
    %c0_i32_0 = arith.constant 0 : i32
    %c0_i32_1 = arith.constant 0 : i32
    %c0_i32_2 = arith.constant 0 : i32
    return %c0_i32, %c0_i32_0, %c0_i32_1 : i32, i32, i32
  }
  func.func @transform_7(%arg0: i32) -> (i32, i32) {
    %c0_i32 = arith.constant 0 : i32
    %c0_i32_0 = arith.constant 0 : i32
    %c0_i32_1 = arith.constant 0 : i32
    return %c0_i32, %c0_i32_0 : i32, i32
  }
  func.func @transform_8(%arg0: i32) -> (i32, i32, i32) {
    %c0_i32 = arith.constant 0 : i32
    %c0_i32_0 = arith.constant 0 : i32
    %c0_i32_1 = arith.constant 0 : i32
    return %arg0, %c0_i32, %c0_i32_0 : i32, i32, i32
  }
}

</mosaic_0001>

<bundles_post_ra>
// kernel: eegnet_v2_forward.1
= control target key start
LH: loop header
LB: loop body
LE: loop exit
PB: predicated region body
PF: predicated region fallthrough
CT: control target
= control target key end

     0   :  { %s2490_s27 = smov 0   ;;  %s2899_s0 = inlined_call_operand.vmem [shape: f32[2,512,144], index: 0, kind: input, shape index: {}]   ;;  %s2900_s1 = inlined_call_operand.vmem [shape: f32[16,512], index: 1, kind: input, shape index: {}]   ;;  %s2901_s2 = inlined_call_operand.vmem [shape: f32[16,1], index: 2, kind: input, shape index: {}]   ;;  %s2902_s3 = inlined_call_operand.vmem [shape: f32[6,16,16], index: 3, kind: input, shape index: {}]   ;;  %s2903_s4 = inlined_call_operand.vmem [shape: f32[16,1], index: 4, kind: input, shape index: {}]   ;;  %s2904_s5 = inlined_call_operand.vmem [shape: f32[144,32], index: 5, kind: input, shape index: {}]   ;;  %s2905_s6 = inlined_call_operand.vmem [shape: f32[6,32,22], index: 6, kind: input, shape index: {}]   ;;  %s2906_s7 = inlined_call_operand.vmem [shape: f32[22,2], index: 7, kind: input, shape index: {}]   ;;  %s2907_s8 = inlined_call_operand.vmem [shape: f32[2,16,2], index: 8, kind: output, shape index: {}]  }
   0x1 LB: > { %s1902_s28 = sadd.s32 4294967295, %s2441_s27   ;;  %p1906_p0 = scmp.ge.s32.totalorder %s2441_s27, 1  ;;  %s2441_s27 = sphi %s2490_s27, %s18_s27  }
   0x2   : > { %p262_p1 = scmp.lt.s32.totalorder %s2441_s27, 3 }
   0x4   : > { %p263_p2 = pnand %p1906_p0, %p262_p1 }
   0x5   : > { %p296_p3 = scmp.lt.s32.totalorder (!%p263_p2), %s1902_s28, 1  ;;  %v435_v0 = vld [vmem:[%s2900_s1 + $0x8] sm:$0xff] (!%p263_p2)  ;;  %v2443_v21 = vmov (!%p263_p2), 0   ;;  %v2444_v25 = vmov (!%p263_p2), 0.0|0.0   ;;  %vm650_vm0 = vcmask (!%p263_p2), 130048   ;;  %vm736_vm5 = vcmask (!%p263_p2), 261120  }
   0x6   : > { %266 = sbr.rel (%p263_p2) target bundleno = 2188 (0x88c), region = 52  ;;  %518 = vmatprep.mubr.f32.mxu0 (!%p263_p2), %v435_v0  ;;  %2421 = vset.pattern.permute.xlu0 (!%p263_p2), %v2443_v21  ;;  %vm1765_vm6 = vcmask (!%p263_p2), 1045504   ;;  %vm1758_vm7 = vcmask (!%p263_p2), 179200   ;;  %vm1844_vm10 = vcmask (!%p263_p2), 15360  }
   0x7   : > { %2290 = vmatprep.subr.bf16.mxu1 (!%p263_p2), %v2444_v25  ;;  %2422 = vset.pattern.permute.xlu1 (!%p263_p2), %v2443_v21 }
   0xd   : > { %s2909_s28 = smov (!%p296_p3, %s1902_s28), 1 }
   0xe   : > { %s1978_s9 = sshll.u32 %s2909_s28, 10 }
   0xf   : > { %s2507_s12 = scalar_lea.vmem %s2899_s0, %s1978_s9  ;;  %s1979_s9 = sshll.u32 %s2909_s28, 4 }
  0x10   : > { %v307_v1 = vld [vmem:[%s2507_s12 + $0x8] sm:$0xff]  ;;  %v309_v2 = vld [vmem:[%s2507_s12 + $0x18] sm:$0xff]  ;;  %v306_v3 = vld [vmem:[%s2507_s12] sm:$0xff]  ;;  %s305_s13 = scalar_lea.vmem %s2907_s8, %s1979_s9 }
  0x11   : > { %v2162_v4 = vpack.c.bf16 %v309_v2, %v307_v1  ;;  %v308_v5 = vld [vmem:[%s2507_s12 + $0x10] sm:$0xff]  ;;  %v311_v6 = vld [vmem:[%s2507_s12 + $0x28] sm:$0xff]  ;;  %v313_v7 = vld [vmem:[%s2507_s12 + $0x38] sm:$0xff] }
  0x12   : > { %v2164_v8 = vpack.c.bf16 %v308_v5, %v306_v3  ;;  %v2166_v9 = vpack.c.bf16 %v313_v7, %v311_v6  ;;  %v310_v10 = vld [vmem:[%s2507_s12 + $0x20] sm:$0xff]  ;;  %v312_v11 = vld [vmem:[%s2507_s12 + $0x30] sm:$0xff]  ;;  %v315_v12 = vld [vmem:[%s2507_s12 + $0x48] sm:$0xff] }
  0x13   : > { %2163 = vmatprep.subr.bf16.mxu0 %v2162_v4  ;;  %v317_v13 = vld [vmem:[%s2507_s12 + $0x58] sm:$0xff]  ;;  %v2168_v14 = vpack.c.bf16 %v312_v11, %v310_v10  ;;  %v314_v16 = vld [vmem:[%s2507_s12 + $0x40] sm:$0xff]  ;;  %v316_v17 = vld [vmem:[%s2507_s12 + $0x50] sm:$0xff] }
  0x14   : > { %2165 = vmatpush1.bf16.msra.mxu0 %v2164_v8  ;;  %v2170_v15 = vpack.c.bf16 %v317_v13, %v315_v12  ;;  %v319_v18 = vld [vmem:[%s2507_s12 + $0x68] sm:$0xff]  ;;  %v321_v19 = vld [vmem:[%s2507_s12 + $0x78] sm:$0xff]  ;;  %v2172_v20 = vpack.c.bf16 %v316_v17, %v314_v16  ;;  %v318_v23 = vld [vmem:[%s2507_s12 + $0x60] sm:$0xff] }
  0x15   : > { %2167 = vmatprep.subr.bf16.mxu0 %v2166_v9  ;;  %v2174_v22 = vpack.c.bf16 %v321_v19, %v319_v18  ;;  %v320_v24 = vld [vmem:[%s2507_s12 + $0x70] sm:$0xff]  ;;  %v323_v26 = vld [vmem:[%s2507_s12 + $0x88] sm:$0xff]  ;;  %v325_v27 = vld [vmem:[%s2507_s12 + $0x98] sm:$0xff] }
  0x16   : > { %v2176_v28 = vpack.c.bf16 %v320_v24, %v318_v23  ;;  %v2178_v29 = vpack.c.bf16 %v325_v27, %v323_v26  ;;  %v322_v30 = vld [vmem:[%s2507_s12 + $0x80] sm:$0xff]  ;;  %v324_v31 = vld [vmem:[%s2507_s12 + $0x90] sm:$0xff]  ;;  %v327_v32 = vld [vmem:[%s2507_s12 + $0xa8] sm:$0xff] }
  0x17   : > { %v329_v33 = vld [vmem:[%s2507_s12 + $0xb8] sm:$0xff]  ;;  %v2180_v34 = vpack.c.bf16 %v324_v31, %v322_v30  ;;  %v326_v36 = vld [vmem:[%s2507_s12 + $0xa0] sm:$0xff]  ;;  %v328_v37 = vld [vmem:[%s2507_s12 + $0xb0] sm:$0xff] }
  0x18   : > { %2169 = vmatpush1.bf16.msra.mxu0 %v2168_v14  ;;  %v2182_v35 = vpack.c.bf16 %v329_v33, %v327_v32  ;;  %v331_v38 = vld [vmem:[%s2507_s12 + $0xc8] sm:$0xff]  ;;  %v333_v39 = vld [vmem:[%s2507_s12 + $0xd8] sm:$0xff]  ;;  %v2184_v40 = vpack.c.bf16 %v328_v37, %v326_v36  ;;  %v330_v42 = vld [vmem:[%s2507_s12 + $0xc0] sm:$0xff] }
  0x19   : > { %2171 = vmatprep.subr.bf16.mxu0 %v2170_v15  ;;  %v2186_v41 = vpack.c.bf16 %v333_v39, %v331_v38  ;;  %v332_v43 = vld [vmem:[%s2507_s12 + $0xd0] sm:$0xff]  ;;  %v335_v44 = vld [vmem:[%s2507_s12 + $0xe8] sm:$0xff]  ;;  %v337_v45 = vld [vmem:[%s2507_s12 + $0xf8] sm:$0xff] }
  0x1a   : > { %v2188_v46 = vpack.c.bf16 %v332_v43, %v330_v42  ;;  %v2190_v47 = vpack.c.bf16 %v337_v45, %v335_v44  ;;  %v334_v48 = vld [vmem:[%s2507_s12 + $0xe0] sm:$0xff]  ;;  %v336_v49 = vld [vmem:[%s2507_s12 + $0xf0] sm:$0xff]  ;;  %v339_v50 = vld [vmem:[%s2507_s12 + $0x108] sm:$0xff] }
  0x1b   : > { %v341_v51 = vld [vmem:[%s2507_s12 + $0x118] sm:$0xff]  ;;  %v2192_v52 = vpack.c.bf16 %v336_v49, %v334_v48  ;;  %v338_v54 = vld [vmem:[%s2507_s12 + $0x100] sm:$0xff]  ;;  %v340_v55 = vld [vmem:[%s2507_s12 + $0x110] sm:$0xff] }
  0x1c   : > { %2173 = vmatpush1.bf16.msra.mxu0 %v2172_v20  ;;  %v2194_v53 = vpack.c.bf16 %v341_v51, %v339_v50  ;;  %v343_v56 = vld [vmem:[%s2507_s12 + $0x128] sm:$0xff]  ;;  %v345_v57 = vld [vmem:[%s2507_s12 + $0x138] sm:$0xff]  ;;  %v2196_v58 = vpack.c.bf16 %v340_v55, %v338_v54  ;;  %v342_v60 = vld [vmem:[%s2507_s12 + $0x120] sm:$0xff] }
  0x1d   : > { %2175 = vmatprep.subr.bf16.mxu0 %v2174_v22  ;;  %v2198_v59 = vpack.c.bf16 %v345_v57, %v343_v56  ;;  %v344_v61 = vld [vmem:[%s2507_s12 + $0x130] sm:$0xff]  ;;  %v347_v62 = vld [vmem:[%s2507_s12 + $0x148] sm:$0xff]  ;;  %v349_v63 = vld [vmem:[%s2507_s12 + $0x158] sm:$0xff] }
  0x1e   : > { %v2200_v0 = vpack.c.bf16 %v344_v61, %v342_v60  ;;  %v2202_v1 = vpack.c.bf16 %v349_v63, %v347_v62  ;;  %v346_v2 = vld [vmem:[%s2507_s12 + $0x140] sm:$0xff]  ;;  %v348_v3 = vld [vmem:[%s2507_s12 + $0x150] sm:$0xff]  ;;  %v351_v4 = vld [vmem:[%s2507_s12 + $0x168] sm:$0xff] }
  0x1f   : > { %v353_v5 = vld [vmem:[%s2507_s12 + $0x178] sm:$0xff]  ;;  %v2204_v6 = vpack.c.bf16 %v348_v3, %v346_v2  ;;  %v350_v8 = vld [vmem:[%s2507_s12 + $0x160] sm:$0xff]  ;;  %v352_v9 = vld [vmem:[%s2507_s12 + $0x170] sm:$0xff] }
  0x20   : > { %2177 = vmatpush1.bf16.msra.mxu0 %v2176_v28  ;;  %v2206_v7 = vpack.c.bf16 %v353_v5, %v351_v4  ;;  %v355_v10 = vld [vmem:[%s2507_s12 + $0x188] sm:$0xff]  ;;  %v357_v11 = vld [vmem:[%s2507_s12 + $0x198] sm:$0xff]  ;;  %v354_v12 = vld [vmem:[%s2507_s12 + $0x180] sm:$0xff]  ;;  %v2208_v13 = vpack.c.bf16 %v352_v9, %v350_v8 }
  0x21   : > { %2179 = vmatprep.subr.bf16.mxu0 %v2178_v29  ;;  %v356_v14 = vld [vmem:[%s2507_s12 + $0x190] sm:$0xff]  ;;  %v442_v15 = vld [vmem:[%s2901_s2] sm:$0xff]  ;;  %v2210_v17 = vpack.c.bf16 %v357_v11, %v355_v10  ;;  %v633_v18 = vld [vmem:[%s2904_s5 + $0x8] sm:$0xff] }
  0x22   : > { %v632_v16 = vld [vmem:[%s2904_s5] sm:$0xff]  ;;  %446 = vperm.xlu0 %2421, %v442_v15   ;;  %v634_v19 = vld [vmem:[%s2904_s5 + $0x10] sm:$0xff]  ;;  %v635_v20 = vld [vmem:[%s2904_s5 + $0x18] sm:$0xff]  ;;  %v2212_v26 = vpack.c.bf16 %v356_v14, %v354_v12 }
  0x23   : > { %v359_v21 = vld [vmem:[%s2507_s12 + $0x1a8] sm:$0xff]  ;;  %v361_v22 = vld [vmem:[%s2507_s12 + $0x1b8] sm:$0xff]  ;;  %v2291_v24 = vpack.c.bf16 %v633_v18, %v632_v16  ;;  %v358_v27 = vld [vmem:[%s2507_s12 + $0x1a0] sm:$0xff]  ;;  %v2294_v28 = vpack.c.bf16 %v635_v20, %v634_v19 }
  0x24   : > { %2181 = vmatpush1.bf16.msra.mxu0 %v2180_v34  ;;  %v443_v23 = vld [vmem:[%s2901_s2 + $0x8] sm:$0xff]  ;;  %v2214_v29 = vpack.c.bf16 %v361_v22, %v359_v21  ;;  %v360_v30 = vld [vmem:[%s2507_s12 + $0x1b0] sm:$0xff]  ;;  %v636_v31 = vld [vmem:[%s2904_s5 + $0x20] sm:$0xff] }
  0x25   : > { %2183 = vmatprep.subr.bf16.mxu0 %v2182_v35  ;;  %2292 = vmatpush1.bf16.msra.mxu1 %v2291_v24  ;;  %v637_v32 = vld [vmem:[%s2904_s5 + $0x28] sm:$0xff]  ;;  %v365_v34 = vld [vmem:[%s2507_s12 + $0x1d8] sm:$0xff]  ;;  %v2216_v35 = vpack.c.bf16 %v360_v30, %v358_v27  ;;  %v362_v38 = vld [vmem:[%s2507_s12 + $0x1c0] sm:$0xff] }
  0x26   : > { %451 = vperm.xlu0 %2421, %v443_v23   ;;  %v363_v33 = vld [vmem:[%s2507_s12 + $0x1c8] sm:$0xff]  ;;  %2293 = vmatprep.subr.bf16.mxu1 %v2444_v25  ;;  %v2297_v36 = vpack.c.bf16 %v637_v32, %v636_v31  ;;  %v364_v39 = vld [vmem:[%s2507_s12 + $0x1d0] sm:$0xff]  ;;  %v366_v44 = vld [vmem:[%s2507_s12 + $0x1e0] sm:$0xff] }
  0x27   : > { %v2218_v37 = vpack.c.bf16 %v365_v34, %v363_v33  ;;  %v2220_v42 = vpack.c.bf16 %v364_v39, %v362_v38  ;;  %v368_v45 = vld [vmem:[%s2507_s12 + $0x1f0] sm:$0xff]  ;;  %v370_v50 = vld [vmem:[%s2507_s12 + $0x200] sm:$0xff]  ;;  %v379_v60 = vld [vmem:[%s2507_s12 + $0x248] sm:$0xff] }
  0x28   : > { %2185 = vmatpush1.bf16.msra.mxu0 %v2184_v40  ;;  %v367_v40 = vld [vmem:[%s2507_s12 + $0x1e8] sm:$0xff]  ;;  %v2224_v48 = vpack.c.bf16 %v368_v45, %v366_v44  ;;  %v372_v51 = vld [vmem:[%s2507_s12 + $0x210] sm:$0xff]  ;;  %v434_v54 = vld [vmem:[%s2900_s1] sm:$0xff] }
  0x29   : > { %2187 = vmatprep.subr.bf16.mxu0 %v2186_v41  ;;  %2295 = vmatpush1.bf16.msra.mxu1 %v2294_v28  ;;  %v369_v41 = vld [vmem:[%s2507_s12 + $0x1f8] sm:$0xff]  ;;  %v2228_v55 = vpack.c.bf16 %v372_v51, %v370_v50  ;;  %v374_v57 = vld [vmem:[%s2507_s12 + $0x220] sm:$0xff]  ;;  %v380_v2 = vld [vmem:[%s2507_s12 + $0x250] sm:$0xff] }
  0x2a   : > { %2296 = vmatprep.subr.bf16.mxu1 %v2444_v25  ;;  %v2222_v43 = vpack.c.bf16 %v369_v41, %v367_v40  ;;  %v381_v61 = vld [vmem:[%s2507_s12 + $0x258] sm:$0xff]  ;;  %v438_v63 = vld [vmem:[%s2900_s1 + $0x20] sm:$0xff]  ;;  %v383_v4 = vld [vmem:[%s2507_s12 + $0x268] sm:$0xff] }
  0x2b   : > { %v437_v3 = vld [vmem:[%s2900_s1 + $0x18] sm:$0xff]  ;;  %v382_v8 = vld [vmem:[%s2507_s12 + $0x260] sm:$0xff]  ;;  %v384_v9 = vld [vmem:[%s2507_s12 + $0x270] sm:$0xff] }
  0x2c   : > { %2189 = vmatpush1.bf16.msra.mxu0 %v2188_v46  ;;  %v371_v46 = vld [vmem:[%s2507_s12 + $0x208] sm:$0xff]  ;;  %v385_v5 = vld [vmem:[%s2507_s12 + $0x278] sm:$0xff]  ;;  %v2240_v12 = vpack.c.bf16 %v384_v9, %v382_v8  ;;  %v386_v14 = vld [vmem:[%s2507_s12 + $0x280] sm:$0xff] }
  0x2d   : > { %2191 = vmatprep.subr.bf16.mxu0 %v2190_v47  ;;  %2298 = vmatpush1.bf16.msra.mxu1 %v2297_v36  ;;  %v373_v47 = vld [vmem:[%s2507_s12 + $0x218] sm:$0xff]  ;;  %v387_v10 = vld [vmem:[%s2507_s12 + $0x288] sm:$0xff]  ;;  %v388_v15 = vld [vmem:[%s2507_s12 + $0x290] sm:$0xff] }
  0x2e   : > { %2299 = vmatprep.subr.bf16.mxu1 %v2444_v25  ;;  %v2226_v49 = vpack.c.bf16 %v373_v47, %v371_v46  ;;  %v389_v11 = vld [vmem:[%s2507_s12 + $0x298] sm:$0xff]  ;;  %v391_v16 = vld [vmem:[%s2507_s12 + $0x2a8] sm:$0xff]  ;;  %v2244_v18 = vpack.c.bf16 %v388_v15, %v386_v14  ;;  %v390_v20 = vld [vmem:[%s2507_s12 + $0x2a0] sm:$0xff] }
  0x2f   : > { %v392_v21 = vld [vmem:[%s2507_s12 + $0x2b0] sm:$0xff]  ;;  %v395_v22 = vld [vmem:[%s2507_s12 + $0x2c8] sm:$0xff]  ;;  %v397_v23 = vld [vmem:[%s2507_s12 + $0x2d8] sm:$0xff] }
  0x30   : > { %2193 = vmatpush1.bf16.msra.mxu0 %v2192_v52  ;;  %v375_v52 = vld [vmem:[%s2507_s12 + $0x228] sm:$0xff]  ;;  %v2248_v24 = vpack.c.bf16 %v392_v21, %v390_v20  ;;  %v394_v27 = vld [vmem:[%s2507_s12 + $0x2c0] sm:$0xff]  ;;  %v396_v28 = vld [vmem:[%s2507_s12 + $0x2d0] sm:$0xff] }
  0x31   : > { %2195 = vmatprep.subr.bf16.mxu0 %v2194_v53  ;;  %v377_v53 = vld [vmem:[%s2507_s12 + $0x238] sm:$0xff]  ;;  %v2252_v31 = vpack.c.bf16 %v396_v28, %v394_v27  ;;  %v398_v33 = vld [vmem:[%s2507_s12 + $0x2e0] sm:$0xff]  ;;  %v400_v34 = vld [vmem:[%s2507_s12 + $0x2f0] sm:$0xff] }
  0x32   : > { %v2230_v56 = vpack.c.bf16 %v377_v53, %v375_v52  ;;  %v401_v30 = vld [vmem:[%s2507_s12 + $0x2f8] sm:$0xff]  ;;  %v402_v39 = vld [vmem:[%s2507_s12 + $0x300] sm:$0xff]  ;;  %v404_v40 = vld [vmem:[%s2507_s12 + $0x310] sm:$0xff] }
  0x33   : > { %v405_v36 = vld [vmem:[%s2507_s12 + $0x318] sm:$0xff]  ;;  %v407_v41 = vld [vmem:[%s2507_s12 + $0x328] sm:$0xff]  ;;  %v406_v45 = vld [vmem:[%s2507_s12 + $0x320] sm:$0xff] }
  0x34   : > { %2197 = vmatpush1.bf16.msra.mxu0 %v2196_v58  ;;  %v376_v58 = vld [vmem:[%s2507_s12 + $0x230] sm:$0xff]  ;;  %v411_v47 = vld [vmem:[%s2507_s12 + $0x348] sm:$0xff]  ;;  %v410_v51 = vld [vmem:[%s2507_s12 + $0x340] sm:$0xff] }
  0x35   : > { %2199 = vmatprep.subr.bf16.mxu0 %v2198_v59  ;;  %v439_v59 = vld [vmem:[%s2900_s1 + $0x28] sm:$0xff]  ;;  %v2232_v62 = vpack.c.bf16 %v376_v58, %v374_v57  ;;  %v408_v46 = vld [vmem:[%s2507_s12 + $0x330] sm:$0xff]  ;;  %v414_v57 = vld [vmem:[%s2507_s12 + $0x360] sm:$0xff] }
  0x36   : > { %v412_v52 = vld [vmem:[%s2507_s12 + $0x350] sm:$0xff]  ;;  %v415_v53 = vld [vmem:[%s2507_s12 + $0x368] sm:$0xff]  ;;  %v429_v8 = vld [vmem:[%s2507_s12 + $0x3d8] sm:$0xff] }
  0x37   : > { %v416_v58 = vld [vmem:[%s2507_s12 + $0x370] sm:$0xff]  ;;  %v433_v14 = vld [vmem:[%s2507_s12 + $0x3f8] sm:$0xff]  ;;  %v640_v27 = vld [vmem:[%s2904_s5 + $0x40] sm:$0xff] }
  0x38   : > { %2201 = vmatpush1.bf16.msra.mxu0 %v2200_v0  ;;  %v2234_v0 = vpack.c.bf16 %v381_v61, %v379_v60  ;;  %v421_v60 = vld [vmem:[%s2507_s12 + $0x398] sm:$0xff]  ;;  %v2272_v61 = vpack.c.bf16 %v416_v58, %v414_v57  ;;  %v436_v20 = vld [vmem:[%s2900_s1 + $0x10] sm:$0xff]  ;;  %v641_v28 = vld [vmem:[%s2904_s5 + $0x48] sm:$0xff] }
  0x39   : > { %2203 = vmatprep.subr.bf16.mxu0 %v2202_v1  ;;  %v378_v1 = vld [vmem:[%s2507_s12 + $0x240] sm:$0xff]  ;;  %v441_v21 = vld [vmem:[%s2900_s1 + $0x38] sm:$0xff] }
  0x3c   : > { %2205 = vmatpush1.bf16.msra.mxu0 %v2204_v6  ;;  %v2236_v6 = vpack.c.bf16 %v380_v2, %v378_v1  ;;  %v423_v1 = vld [vmem:[%s2507_s12 + $0x3a8] sm:$0xff]  ;;  %v425_v2 = vld [vmem:[%s2507_s12 + $0x3b8] sm:$0xff] }
  0x3d   : > { %2207 = vmatprep.subr.bf16.mxu0 %v2206_v7  ;;  %v2238_v7 = vpack.c.bf16 %v385_v5, %v383_v4  ;;  %v2278_v4 = vpack.c.bf16 %v425_v2, %v423_v1  ;;  %v422_v5 = vld [vmem:[%s2507_s12 + $0x3a0] sm:$0xff] }
  0x40   : > { %2209 = vmatpush1.bf16.msra.mxu0 %v2208_v13  ;;  %v2242_v13 = vpack.c.bf16 %v389_v11, %v387_v10  ;;  %v426_v11 = vld [vmem:[%s2507_s12 + $0x3c0] sm:$0xff] }
  0x41   : > { %2211 = vmatprep.subr.bf16.mxu0 %v2210_v17  ;;  %v393_v17 = vld [vmem:[%s2507_s12 + $0x2b8] sm:$0xff] }
  0x42   : > { %v2246_v19 = vpack.c.bf16 %v393_v17, %v391_v16  ;;  %v430_v17 = vld [vmem:[%s2507_s12 + $0x3e0] sm:$0xff] }
  0x44   : > { %2213 = vmatpush1.bf16.msra.mxu0 %v2212_v26  ;;  %v2250_v26 = vpack.c.bf16 %v397_v23, %v395_v22  ;;  %v440_v22 = vld [vmem:[%s2900_s1 + $0x30] sm:$0xff] }
  0x45   : > { %2215 = vmatprep.subr.bf16.mxu0 %v2214_v29  ;;  %v399_v29 = vld [vmem:[%s2507_s12 + $0x2e8] sm:$0xff]  ;;  %v638_v23 = vld [vmem:[%s2904_s5 + $0x30] sm:$0xff] }
  0x46   : > { %v2254_v32 = vpack.c.bf16 %v401_v30, %v399_v29  ;;  %v2303_v29 = vpack.c.bf16 %v641_v28, %v640_v27  ;;  %v642_v30 = vld [vmem:[%s2904_s5 + $0x50] sm:$0xff] }
  0x48   : > { %2217 = vmatpush1.bf16.msra.mxu0 %v2216_v35  ;;  %v403_v35 = vld [vmem:[%s2507_s12 + $0x308] sm:$0xff] }
  0x49   : > { %2219 = vmatprep.subr.bf16.mxu0 %v2218_v37  ;;  %v2256_v37 = vpack.c.bf16 %v400_v34, %v398_v33  ;;  %v2258_v38 = vpack.c.bf16 %v405_v36, %v403_v35  ;;  %v644_v33 = vld [vmem:[%s2904_s5 + $0x60] sm:$0xff]  ;;  %v645_v34 = vld [vmem:[%s2904_s5 + $0x68] sm:$0xff]  ;;  %v646_v36 = vld [vmem:[%s2904_s5 + $0x70] sm:$0xff] }
  0x4a   : > { %v2309_v35 = vpack.c.bf16 %v645_v34, %v644_v33  ;;  %v1926_v33 = vld [vmem:[%s2902_s3 + $0x18] sm:$0xff]  ;;  %v818_v34 = vld [vmem:[%s2902_s3] sm:$0xff] }
  0x4c   : > { %2221 = vmatpush1.bf16.msra.mxu0 %v2220_v42  ;;  %v409_v42 = vld [vmem:[%s2507_s12 + $0x338] sm:$0xff] }
  0x4d   : > { %2223 = vmatprep.subr.bf16.mxu0 %v2222_v43  ;;  %v2260_v43 = vpack.c.bf16 %v404_v40, %v402_v39  ;;  %v2262_v44 = vpack.c.bf16 %v409_v42, %v407_v41  ;;  %v648_v39 = vld [vmem:[%s2904_s5 + $0x80] sm:$0xff]  ;;  %v649_v40 = vld [vmem:[%s2904_s5 + $0x88] sm:$0xff] }
  0x4e   : > { %v2315_v41 = vpack.c.bf16 %v649_v40, %v648_v39  ;;  %v732_v42 = vld [vmem:[%s2905_s6] sm:$0xff] }
  0x4f   : > { %v1937_v40 = vld [vmem:[%s2902_s3 + $0x20] sm:$0xff] }
  0x50   : > { %2225 = vmatpush1.bf16.msra.mxu0 %v2224_v48  ;;  %v413_v48 = vld [vmem:[%s2507_s12 + $0x358] sm:$0xff] }
  0x51   : > { %2227 = vmatprep.subr.bf16.mxu0 %v2226_v49  ;;  %v2264_v49 = vpack.c.bf16 %v408_v46, %v406_v45  ;;  %v2266_v50 = vpack.c.bf16 %v413_v48, %v411_v47 }
  0x53   : > { %519 = vmatmul.mubr.f32.vlgmr.msra.gmra.mrb[0].mxu0 %v434_v54  ;;  %v417_v54 = vld [vmem:[%s2507_s12 + $0x378] sm:$0xff] }
  0x54   : > { %2229 = vmatpush1.bf16.msra.mxu0 %v2228_v55  ;;  %524 = vmatprep.mubr.f32.mxu0 %v439_v59  ;;  %v2268_v55 = vpack.c.bf16 %v412_v52, %v410_v51  ;;  %v419_v59 = vld [vmem:[%s2507_s12 + $0x388] sm:$0xff] }
  0x55   : > { %2231 = vmatprep.subr.bf16.mxu0 %v2230_v56  ;;  %v2270_v56 = vpack.c.bf16 %v417_v54, %v415_v53 }
  0x57   : > { %525 = vmatmul.mubr.f32.gmra.mrb[2].mxu0 %v438_v63  ;;  %v418_v63 = vld [vmem:[%s2507_s12 + $0x380] sm:$0xff] }
  0x58   : > { %2233 = vmatpush1.bf16.msra.mxu0 %v2232_v62  ;;  %595 = vmatprep.mubr.f32.mxu0 %v437_v3  ;;  %v2274_v62 = vpack.c.bf16 %v421_v60, %v419_v59 }
  0x59   : > { %2235 = vmatprep.subr.bf16.mxu0 %v2234_v0  ;;  %v420_v0 = vld [vmem:[%s2507_s12 + $0x390] sm:$0xff] }
  0x5a   : > { %v2276_v3 = vpack.c.bf16 %v420_v0, %v418_v63 }
  0x5c   : > { %2237 = vmatpush1.bf16.msra.mxu0 %v2236_v6  ;;  %v424_v6 = vld [vmem:[%s2507_s12 + $0x3b0] sm:$0xff] }
  0x5d   : > { %2239 = vmatprep.subr.bf16.mxu0 %v2238_v7  ;;  %v427_v7 = vld [vmem:[%s2507_s12 + $0x3c8] sm:$0xff]  ;;  %v2280_v9 = vpack.c.bf16 %v424_v6, %v422_v5 }
  0x5e   : > { %v2282_v10 = vpack.c.bf16 %v429_v8, %v427_v7 }
  0x60   : > { %2241 = vmatpush1.bf16.msra.mxu0 %v2240_v12  ;;  %v428_v12 = vld [vmem:[%s2507_s12 + $0x3d0] sm:$0xff] }
  0x61   : > { %2243 = vmatprep.subr.bf16.mxu0 %v2242_v13  ;;  %v431_v13 = vld [vmem:[%s2507_s12 + $0x3e8] sm:$0xff]  ;;  %v2284_v15 = vpack.c.bf16 %v428_v12, %v426_v11  ;;  %v735_v11 = vld [vmem:[%s2905_s6 + $0x18] sm:$0xff] }
  0x62   : > { %v2286_v16 = vpack.c.bf16 %v433_v14, %v431_v13  ;;  %v1919_v13 = vld [vmem:[%s2905_s6 + $0x20] sm:$0xff]  ;;  %v1920_v14 = vld [vmem:[%s2905_s6 + $0x28] sm:$0xff] }
  0x64   : > { %2245 = vmatpush1.bf16.msra.mxu0 %v2244_v18  ;;  %v432_v18 = vld [vmem:[%s2507_s12 + $0x3f0] sm:$0xff] }
  0x65   : > { %2247 = vmatprep.subr.bf16.mxu0 %v2246_v19  ;;  %v2288_v19 = vpack.c.bf16 %v432_v18, %v430_v17  ;;  %v1921_v17 = vld [vmem:[%s2905_s6 + $0x30] sm:$0xff]  ;;  %v1922_v18 = vld [vmem:[%s2905_s6 + $0x38] sm:$0xff] }
  0x68   : > { %2249 = vmatpush1.bf16.msra.mxu0 %v2248_v24  ;;  %v639_v24 = vld [vmem:[%s2904_s5 + $0x38] sm:$0xff] }
  0x69   : > { %2251 = vmatprep.subr.bf16.mxu0 %v2250_v26  ;;  %v2300_v26 = vpack.c.bf16 %v639_v24, %v638_v23  ;;  %v1925_v23 = vld [vmem:[%s2902_s3 + $0x10] sm:$0xff] }
  0x6b   : > { %2301 = vmatpush1.bf16.msra.mxu1 %v2300_v26 }
  0x6c   : > { %2253 = vmatpush1.bf16.msra.mxu0 %v2252_v31  ;;  %2302 = vmatprep.subr.bf16.mxu1 %v2444_v25  ;;  %v643_v31 = vld [vmem:[%s2904_s5 + $0x58] sm:$0xff] }
  0x6d   : > { %2255 = vmatprep.subr.bf16.mxu0 %v2254_v32  ;;  %v2306_v32 = vpack.c.bf16 %v643_v31, %v642_v30  ;;  %v1931_v31 = vld [vmem:[%s2905_s6 + $0x40] sm:$0xff] }
  0x6f   : > { %2304 = vmatpush1.bf16.msra.mxu1 %v2303_v29 }
  0x70   : > { %2257 = vmatpush1.bf16.msra.mxu0 %v2256_v37  ;;  %2305 = vmatprep.subr.bf16.mxu1 %v2444_v25  ;;  %v647_v37 = vld [vmem:[%s2904_s5 + $0x78] sm:$0xff] }
  0x71   : > { %2259 = vmatprep.subr.bf16.mxu0 %v2258_v38  ;;  %v2312_v38 = vpack.c.bf16 %v647_v37, %v646_v36  ;;  %v1933_v36 = vld [vmem:[%s2905_s6 + $0x50] sm:$0xff]  ;;  %v1934_v37 = vld [vmem:[%s2905_s6 + $0x58] sm:$0xff] }
  0x72   : > { %v2345_v39 = vpack.c.bf16 %v1934_v37, %v1933_v36 }
  0x73   : > { %2307 = vmatpush1.bf16.msra.mxu1 %v2306_v32  ;;  %v1932_v32 = vld [vmem:[%s2905_s6 + $0x48] sm:$0xff] }
  0x74   : > { %2261 = vmatpush1.bf16.msra.mxu0 %v2260_v43  ;;  %2308 = vmatprep.subr.bf16.mxu1 %v2444_v25  ;;  %v733_v43 = vld [vmem:[%s2905_s6 + $0x8] sm:$0xff] }
  0x75   : > { %2263 = vmatprep.subr.bf16.mxu0 %v2262_v44  ;;  %v2317_v44 = vpack.c.bf16 %v733_v43, %v732_v42  ;;  %v1942_v42 = vld [vmem:[%s2905_s6 + $0x68] sm:$0xff] }
  0x77   : > { %2310 = vmatpush1.bf16.msra.mxu1 %v2309_v35  ;;  %v2341_v35 = vpack.c.bf16 %v1932_v32, %v1931_v31 }
  0x78   : > { %2265 = vmatpush1.bf16.msra.mxu0 %v2264_v49  ;;  %2311 = vmatprep.subr.bf16.mxu1 %v2444_v25 }
  0x79   : > { %2267 = vmatprep.subr.bf16.mxu0 %v2266_v50 }
  0x7b   : > { %2313 = vmatpush1.bf16.msra.mxu1 %v2312_v38  ;;  %v819_v38 = vld [vmem:[%s2902_s3 + $0x8] sm:$0xff] }
  0x7c   : > { %2269 = vmatpush1.bf16.msra.mxu0 %v2268_v55  ;;  %2314 = vmatprep.subr.bf16.mxu1 %v2444_v25 }
  0x7d   : > { %2271 = vmatprep.subr.bf16.mxu0 %v2270_v56 }
  0x7f   : > { %2316 = vmatpush1.bf16.msra.mxu1 %v2315_v41  ;;  %v1941_v41 = vld [vmem:[%s2905_s6 + $0x60] sm:$0xff] }
  0x80   : > { %2273 = vmatpush1.bf16.msra.mxu0 %v2272_v61  ;;  %2318 = vmatprep.subr.bf16.mxu1 %v2317_v44 }
  0x81   : > { %2275 = vmatprep.subr.bf16.mxu0 %v2274_v62 }
  0x84   : > { %2277 = vmatpush1.bf16.msra.mxu0 %v2276_v3 }
  0x85   : > { %2279 = vmatprep.subr.bf16.mxu0 %v2278_v4 }
  0x88   : > { %2281 = vmatpush1.bf16.msra.mxu0 %v2280_v9 }
  0x89   : > { %2283 = vmatprep.subr.bf16.mxu0 %v2282_v10  ;;  %v734_v10 = vld [vmem:[%s2905_s6 + $0x10] sm:$0xff] }
  0x8a   : > { %v2321_v12 = vpack.c.bf16 %v735_v11, %v734_v10  ;;  %v1730_v10 = vld [vmem:[%s2903_s4 + $0x8] sm:$0xff] }
  0x8c   : > { %2285 = vmatpush1.bf16.msra.mxu0 %v2284_v15  ;;  %v2325_v15 = vpack.c.bf16 %v1920_v14, %v1919_v13  ;;  %v1968_v14 = vld [vmem:[%s2902_s3 + $0x58] sm:$0xff] }
  0x8d   : > { %2287 = vmatprep.subr.bf16.mxu0 %v2286_v16 }
  0x90   : > { %2289 = vmatpush1.bf16.msra.mxu0 %v2288_v19 }
  0x93   : > { %596 = vmatmul.mubr.f32.vlgmr.msra.gmra.mrb[0].mxu0 %v436_v20  ;;  %v2329_v20 = vpack.c.bf16 %v1922_v18, %v1921_v17  ;;  %v1757_v18 = vld [vmem:[%s2906_s7 + $0x10] sm:$0x3f] }
  0x94   : > { %601 = vmatprep.mubr.f32.mxu0 %v441_v21 }
  0x97   : > { %602 = vmatmul.mubr.f32.gmra.mrb[2].mxu0 %v440_v22 }
  0xa1   : > { %v447_v45 = vpop.permute.xlu0 %446 }
  0xa5   : > { %v452_v51 = vpop.permute.xlu0 %451 }
 0x166   : > { %v597_v46 = vpop.f32.mrb[0].mxu0 }
 0x167   : > { %v2393_v47 = vadd.f32 %v597_v46, %v447_v45  ;;  %v599_v48 = vpop.f32.mrb[1].mxu0  ;;  %v2353_v46 = vpack.c.bf16 %v1942_v42, %v1941_v41 }
 0x168   : > { %v2394_v49 = vadd.f32 %v599_v48, %v447_v45  ;;  %v1944_v48 = vld [vmem:[%s2905_s6 + $0x78] sm:$0xff] }
 0x169   : > { %v612_v50 = vmin.f32 %v2393_v47, 0.0  ;;  %vm608_vm2 = vcmp.gt.f32.partialorder %v2393_v47, 0.0 }
 0x16a   : > { %v613_v52 = vmin.f32 %v2394_v49, 0.0  ;;  %v603_v25 = vpop.f32.mrb[2].mxu0  ;;  %vm609_vm1 = vcmp.gt.f32.partialorder %v2394_v49, 0.0 }
 0x16b   : > { %v616_v53 = vmul.f32 1.442695, %v612_v50  ;;  %v2395_v54 = vadd.f32 %v603_v25, %v452_v51  ;;  %v605_v55 = vpop.f32.mrb[3].mxu0  ;;  %v1952_v25 = vld [vmem:[%s2905_s6 + $0x88] sm:$0xff] }
 0x16c   : > { %v618_v56 = vmul.f32 1.442695, %v613_v52  ;;  %v2396_v57 = vadd.f32 %v605_v55, %v452_v51  ;;  %v1947_v51 = vld [vmem:[%s2902_s3 + $0x30] sm:$0xff]  ;;  %v1951_v52 = vld [vmem:[%s2905_s6 + $0x80] sm:$0xff] }
 0x16d   : > { %2423 = vpow2.f32 %v616_v53  ;;  %v614_v58 = vmin.f32 %v2395_v54, 0.0  ;;  %vm610_vm4 = vcmp.gt.f32.partialorder %v2395_v54, 0.0 }
 0x16e   : > { %2425 = vpow2.f32 %v618_v56  ;;  %v615_v59 = vmin.f32 %v2396_v57, 0.0  ;;  %vm611_vm3 = vcmp.gt.f32.partialorder %v2396_v57, 0.0  ;;  %v2365_v56 = vpack.c.bf16 %v1952_v25, %v1951_v52 }
 0x16f   : > { %v620_v60 = vmul.f32 1.442695, %v614_v58  ;;  %v1954_v58 = vld [vmem:[%s2905_s6 + $0x98] sm:$0xff] }
 0x170   : > { %v622_v61 = vmul.f32 1.442695, %v615_v59  ;;  %v1948_v59 = vld [vmem:[%s2902_s3 + $0x38] sm:$0xff] }
 0x171   : > { %2427 = vpow2.f32 %v620_v60 }
 0x172   : > { %2429 = vpow2.f32 %v622_v61  ;;  %v1957_v61 = vld [vmem:[%s2902_s3 + $0x40] sm:$0xff] }
 0x177   : > { %v2424_v62 = vpop.eup %2423 }
 0x178   : > { %v2426_v63 = vpop.eup %2425  ;;  %v1911_v0 = vadd.f32 -1.0, %v2424_v62  ;;  %v1961_v62 = vld [vmem:[%s2905_s6 + $0xa0] sm:$0xff] }
 0x179   : > { %v1912_v1 = vadd.f32 -1.0, %v2426_v63  ;;  %v1962_v63 = vld [vmem:[%s2905_s6 + $0xa8] sm:$0xff] }
 0x17a   : > { %v628_v5 = vsel %vm608_vm2, %v2393_v47, %v1911_v0  ;;  %v1943_v47 = vld [vmem:[%s2905_s6 + $0x70] sm:$0xff] }
 0x17b   : > { %v2428_v2 = vpop.eup %2427  ;;  %v629_v3 = vsel %vm609_vm1, %v2394_v49, %v1912_v1  ;;  %v1938_v49 = vld [vmem:[%s2902_s3 + $0x28] sm:$0xff]  ;;  %v2357_v50 = vpack.c.bf16 %v1944_v48, %v1943_v47 }
 0x17c   : > { %v2430_v4 = vpop.eup %2429  ;;  %1915 = vmatprep.mubr.msk.f32.mxu1 %vm650_vm0, %v629_v3  ;;  %v1913_v6 = vadd.f32 -1.0, %v2428_v2  ;;  %v2377_v3 = vpack.c.bf16 %v1962_v63, %v1961_v62 }
 0x17d   : > { %722 = vmatmul.mubr.f32.vlgmr.msra.gmra.mrb[0].mxu1 %v628_v5  ;;  %v1914_v7 = vadd.f32 -1.0, %v2430_v4  ;;  %v1963_v4 = vld [vmem:[%s2905_s6 + $0xb0] sm:$0xff]  ;;  %v1964_v5 = vld [vmem:[%s2905_s6 + $0xb8] sm:$0xff] }
 0x17e   : > { %2320 = vmatpush3.bf16.msra.mxu1 %v2317_v44  ;;  %v630_v9 = vsel %vm610_vm4, %v2395_v54, %v1913_v6  ;;  %v1958_v6 = vld [vmem:[%s2902_s3 + $0x48] sm:$0xff] }
 0x17f   : > { %v631_v8 = vsel %vm611_vm3, %v2396_v57, %v1914_v7  ;;  %2322 = vmatprep.subr.bf16.mxu1 %v2321_v12  ;;  %v1953_v57 = vld [vmem:[%s2905_s6 + $0x90] sm:$0xff]  ;;  %v2381_v7 = vpack.c.bf16 %v1964_v5, %v1963_v4 }
 0x180   : > { %1916 = vmatprep.mubr.msk.f32.mxu1 %vm650_vm0, %v631_v8  ;;  %v2369_v60 = vpack.c.bf16 %v1954_v58, %v1953_v57  ;;  %v1967_v8 = vld [vmem:[%s2902_s3 + $0x50] sm:$0xff] }
 0x181   : > { %727 = vmatmul.mubr.f32.gmra.mrb[2].mxu1 %v630_v9  ;;  %v1729_v9 = vld [vmem:[%s2903_s4] sm:$0xff] }
 0x182   : > { %2324 = vmatpush3.bf16.msra.mxu1 %v2321_v12  ;;  %1733 = vperm.xlu1 %2422, %v1729_v9  }
 0x183   : > { %2326 = vmatprep.subr.bf16.mxu1 %v2325_v15 }
 0x186   : > { %1738 = vperm.xlu1 %2422, %v1730_v10  }
 0x250   : > { %v2747_v16 = vpop.f32.mrb[0].mxu1 }
 0x251   : > { %v725_v19 = vpop.f32.mrb[1].mxu1  ;;  %2053 = vmatprep.mubr.msk.f32.mxu1 %vm736_vm5, %v2747_v16 }
 0x252   : > { %v1734_v19 = vpop.permute.xlu1 %1733 }
 0x254   : > { %v2757_v21 = vpop.f32.mrb[2].mxu1 }
 0x255   : > { %v730_v22 = vpop.f32.mrb[3].mxu1  ;;  %2054 = vmatmul.mubr.msk.f32.vlgmr.msra.gmra.mrb[4].mxu1 %vm736_vm5, %v2757_v21 }
 0x256   : > { %2328 = vmatpush3.bf16.msra.mxu1 %v2325_v15  ;;  %2064 = vmatprep.mubr.msk.f32.mxu1 %vm736_vm5, %v2747_v16  ;;  %v1755_v15 = vld [vmem:[%s2906_s7] sm:$0xff] }
 0x257   : > { %2330 = vmatprep.subr.bf16.mxu1 %v2329_v20 }
 0x25a   : > { %2332 = vmatpush3.bf16.msra.mxu1 %v2329_v20  ;;  %v1739_v20 = vpop.permute.xlu1 %1738 }
 0x25d   : > { %2065 = vmatmul.mubr.msk.f32.vlgmr.msra.gmra.mrb[6].mxu1 %vm736_vm5, %v2757_v21 }
 0x25e   : > { %2071 = vmatprep.mubr.msk.f32.mxu1 %vm650_vm0, %v1925_v23 }
 0x328   : > { %v2055_v24 = vpop.f32.mrb[4].mxu1 }
 0x329   : > { %v809_v26 = vpop.f32.mrb[5].mxu1 }
 0x32a   : > { %v2337_v27 = vpack.c.bf16 %v2055_v24, %v809_v26 }
 0x330   : > { %v2066_v28 = vpop.f32.mrb[6].mxu1 }
 0x331   : > { %v891_v29 = vpop.f32.mrb[7].mxu1 }
 0x332   : > { %v2333_v30 = vpack.c.bf16 %v2066_v28, %v891_v29 }
 0x334   : > { %2334 = vmatprep.subr.bf16.mxu1 %v2333_v30 }
 0x335   : > { %2336 = vmatpush3.bf16.msra.mxu1 %v2333_v30 }
 0x336   : > { %2338 = vmatprep.subr.bf16.mxu1 %v2337_v27 }
 0x338   : > { %2072 = vmatmul.mubr.msk.f32.vlgmr.msra.gmra.mrb[8].mxu1 %vm650_vm0, %v1926_v33 }
 0x339   : > { %2340 = vmatpush3.bf16.msra.mxu1 %v2337_v27  ;;  %2078 = vmatprep.mubr.msk.f32.mxu1 %vm650_vm0, %v818_v34 }
 0x33a   : > { %2342 = vmatprep.subr.bf16.mxu1 %v2341_v35 }
 0x340   : > { %2079 = vmatmul.mubr.msk.f32.vlgmr.msra.gmra.mrb[8].mxu1 %vm650_vm0, %v819_v38 }
 0x341   : > { %2344 = vmatpush3.bf16.msra.mxu1 %v2341_v35  ;;  %2089 = vmatprep.mubr.msk.f32.mxu1 %vm736_vm5, %v2747_v16 }
 0x342   : > { %2346 = vmatprep.subr.bf16.mxu1 %v2345_v39 }
 0x345   : > { %2348 = vmatpush3.bf16.msra.mxu1 %v2345_v39 }
 0x348   : > { %2090 = vmatmul.mubr.msk.f32.vlgmr.msra.gmra.mrb[10].mxu1 %vm736_vm5, %v2757_v21 }
 0x349   : > { %2096 = vmatprep.mubr.msk.f32.mxu1 %vm650_vm0, %v1937_v40 }
 0x41b   : > { %v2091_v43 = vpop.f32.mrb[10].mxu1 }
 0x41c   : > { %v1136_v44 = vpop.f32.mrb[11].mxu1 }
 0x41d   : > { %v2349_v45 = vpack.c.bf16 %v2091_v43, %v1136_v44 }
 0x41f   : > { %2350 = vmatprep.subr.bf16.mxu1 %v2349_v45 }
 0x420   : > { %2352 = vmatpush3.bf16.msra.mxu1 %v2349_v45 }
 0x421   : > { %2354 = vmatprep.subr.bf16.mxu1 %v2353_v46 }
 0x423   : > { %2097 = vmatmul.mubr.msk.f32.vlgmr.msra.gmra.mrb[8].mxu1 %vm650_vm0, %v1938_v49 }
 0x424   : > { %2356 = vmatpush3.bf16.msra.mxu1 %v2353_v46  ;;  %2107 = vmatprep.mubr.msk.f32.mxu1 %vm736_vm5, %v2747_v16 }
 0x425   : > { %2358 = vmatprep.subr.bf16.mxu1 %v2357_v50 }
 0x428   : > { %2360 = vmatpush3.bf16.msra.mxu1 %v2357_v50 }
 0x42b   : > { %2108 = vmatmul.mubr.msk.f32.vlgmr.msra.gmra.mrb[12].mxu1 %vm736_vm5, %v2757_v21 }
 0x42c   : > { %2114 = vmatprep.mubr.msk.f32.mxu1 %vm650_vm0, %v1947_v51 }
 0x4fe   : > { %v2109_v53 = vpop.f32.mrb[12].mxu1 }
 0x4ff   : > { %v1302_v54 = vpop.f32.mrb[13].mxu1 }
 0x500   : > { %v2361_v55 = vpack.c.bf16 %v2109_v53, %v1302_v54 }
 0x502   : > { %2362 = vmatprep.subr.bf16.mxu1 %v2361_v55 }
 0x503   : > { %2364 = vmatpush3.bf16.msra.mxu1 %v2361_v55 }
 0x504   : > { %2366 = vmatprep.subr.bf16.mxu1 %v2365_v56 }
 0x506   : > { %2115 = vmatmul.mubr.msk.f32.vlgmr.msra.gmra.mrb[8].mxu1 %vm650_vm0, %v1948_v59 }
 0x507   : > { %2368 = vmatpush3.bf16.msra.mxu1 %v2365_v56  ;;  %2125 = vmatprep.mubr.msk.f32.mxu1 %vm736_vm5, %v2747_v16 }
 0x508   : > { %2370 = vmatprep.subr.bf16.mxu1 %v2369_v60 }
 0x50b   : > { %2372 = vmatpush3.bf16.msra.mxu1 %v2369_v60 }
 0x50e   : > { %2126 = vmatmul.mubr.msk.f32.vlgmr.msra.gmra.mrb[14].mxu1 %vm736_vm5, %v2757_v21 }
 0x50f   : > { %2132 = vmatprep.mubr.msk.f32.mxu1 %vm650_vm0, %v1957_v61 }
 0x5e1   : > { %v2127_v0 = vpop.f32.mrb[14].mxu1 }
 0x5e2   : > { %v1468_v1 = vpop.f32.mrb[15].mxu1 }
 0x5e3   : > { %v2373_v2 = vpack.c.bf16 %v2127_v0, %v1468_v1 }
 0x5e5   : > { %2374 = vmatprep.subr.bf16.mxu1 %v2373_v2 }
 0x5e6   : > { %2376 = vmatpush3.bf16.msra.mxu1 %v2373_v2 }
 0x5e7   : > { %2378 = vmatprep.subr.bf16.mxu1 %v2377_v3 }
 0x5e9   : > { %2133 = vmatmul.mubr.msk.f32.vlgmr.msra.gmra.mrb[8].mxu1 %vm650_vm0, %v1958_v6 }
 0x5ea   : > { %2380 = vmatpush3.bf16.msra.mxu1 %v2377_v3  ;;  %2143 = vmatprep.mubr.msk.f32.mxu1 %vm736_vm5, %v2747_v16  ;;  %v1756_v16 = vld [vmem:[%s2906_s7 + $0x8] sm:$0xff] }
 0x5eb   : > { %2382 = vmatprep.subr.bf16.mxu1 %v2381_v7  ;;  %v2389_v17 = vpack.c.bf16 %v1756_v16, %v1755_v15 }
 0x5ee   : > { %2384 = vmatpush3.bf16.msra.mxu1 %v2381_v7 }
 0x5f1   : > { %2144 = vmatmul.mubr.msk.f32.vlgmr.msra.gmra.mrb[16].mxu1 %vm736_vm5, %v2757_v21 }
 0x5f2   : > { %2150 = vmatprep.mubr.msk.f32.mxu1 %vm650_vm0, %v1967_v8 }
 0x6c4   : > { %v2145_v11 = vpop.f32.mrb[16].mxu1 }
 0x6c5   : > { %v1634_v12 = vpop.f32.mrb[17].mxu1 }
 0x6c6   : > { %v2385_v13 = vpack.c.bf16 %v2145_v11, %v1634_v12 }
 0x6c8   : > { %2386 = vmatprep.subr.bf16.mxu1 %v2385_v13 }
 0x6c9   : > { %2388 = vmatpush3.bf16.msra.mxu1 %v2385_v13 }
 0x6ca   : > { %2390 = vmatprep.subr.bf16.mxu1 %v2389_v17 }
 0x6cc   : > { %2151 = vmatmul.mubr.msk.f32.vlgmr.msra.gmra.mrb[8].mxu1 %vm650_vm0, %v1968_v14 }
 0x6cd   : > { %2392 = vmatpush3.bf16.msra.mxu1 %v2389_v17 }
 0x6ce   : > { %2157 = vmatprep.subr.msk.mxu1 %vm1765_vm6, %v1757_v18 }
 0x6d1   : > { %2158 = vmatpush3.msk.msra.mxu1 %vm1765_vm6, %v1757_v18 }
 0x79f   : > { %v2152_v21 = vpop.f32.mrb[8].mxu1 }
 0x7a0   : > { %v1742_v22 = vadd.f32 %v2152_v21, %v1739_v20  ;;  %v1718_v23 = vpop.f32.mrb[9].mxu1 }
 0x7a1   : > { %v1741_v24 = vadd.f32 %v1734_v19, %v1718_v23 }
 0x7a2   : > { %v1746_v26 = vmin.f32 %v1742_v22, 0.0  ;;  %vm1744_vm9 = vcmp.gt.f32.partialorder %v1742_v22, 0.0 }
 0x7a3   : > { %v1745_v27 = vmin.f32 %v1741_v24, 0.0  ;;  %vm1743_vm8 = vcmp.gt.f32.partialorder %v1741_v24, 0.0 }
 0x7a4   : > { %v1749_v28 = vmul.f32 1.442695, %v1746_v26 }
 0x7a5   : > { %v1747_v29 = vmul.f32 1.442695, %v1745_v27 }
 0x7a6   : > { %2431 = vpow2.f32 %v1749_v28 }
 0x7a7   : > { %2433 = vpow2.f32 %v1747_v29 }
 0x7b0   : > { %v2432_v30 = vpop.eup %2431 }
 0x7b1   : > { %v2434_v31 = vpop.eup %2433  ;;  %v1972_v32 = vadd.f32 -1.0, %v2432_v30 }
 0x7b2   : > { %v1971_v33 = vadd.f32 -1.0, %v2434_v31 }
 0x7b3   : > { %v1754_v35 = vsel %vm1744_vm9, %v1742_v22, %v1972_v32 }
 0x7b4   : > { %v1753_v34 = vsel %vm1743_vm8, %v1741_v24, %v1971_v33 }
 0x7b5   : > { %2159 = vmatprep.mubr.msk.f32.mxu1 %vm1758_vm7, %v1753_v34 }
 0x7b6   : > { %2160 = vmatmul.mubr.msk.f32.vlgmr.msra.gmra.mrb[18].mxu1 %vm1758_vm7, %v1754_v35 }
 0x889   : > { %v2161_v36 = vpop.f32.mrb[18].mxu1 }
 0x88a   : > { %1846 = vst.msk [vmem:[%s305_s13 + $0x8] sm:$0xff] %vm1844_vm10, %v2161_v36  ;;  %v1835_v37 = vpop.f32.mrb[19].mxu1 }
 0x88b   : > { %1845 = vst.msk [vmem:[%s305_s13] sm:$0xff] %vm1844_vm10, %v1835_v37 }
 0x88c PF: > { %s18_s27 = sadd.s32 1, %s2441_s27  }
 0x88d   : > { %p15_p4 = scmp.ge.s32.totalorder %s18_s27, 4  }
 0x88f   :  { %17 = sbr.rel (!%p15_p4) target bundleno = 1 (0x1), region = 92 }

</bundles_post_ra>
